<compile_context>
chip_gen: v6e
topology: v6e:2x2x1
jax: 0.10.0
libtpu: 0.0.40
codegen_flags: <defaults>
</compile_context>

<pallas_src>
import functools

import jax
import jax.numpy as jnp
from jax.experimental import pallas as pl
from jax.experimental.pallas import tpu as pltpu


def _attention_kernel(hl_ref, hr_ref, mu_lr_ref, mu_rl_ref, *, nl, nr):
    xl = hl_ref[...]                      # (NLP, DP) f32, rows >= nl are zero
    xr = hr_ref[...]                      # (NRP, DP) f32, rows >= nr are zero

    # Row-wise L2 normalization (EUP rsqrt). eps keeps zero-padded rows (and
    # any zero-norm input row) finite instead of 0/0 = NaN.
    hl = xl * jax.lax.rsqrt(jnp.sum(xl * xl, axis=-1, keepdims=True) + 1e-12)
    hr = xr * jax.lax.rsqrt(jnp.sum(xr * xr, axis=-1, keepdims=True) + 1e-12)

    # bf16 operands for the MXU, f32 accumulation.
    hl_b = hl.astype(jnp.bfloat16)
    hr_b = hr.astype(jnp.bfloat16)

    # a[i, j] = <hl_i, hr_j>  -- contract last dim vs last dim (no hr.T).
    a = jax.lax.dot_general(hl_b, hr_b, (((1,), (1,)), ((), ())),
                            preferred_element_type=jnp.float32)   # (NLP, NRP)
    nlp, nrp = a.shape

    # Single exp pass.  Invariant: hl/hr are unit-norm here, so |a| <= 1 and
    # exp(a) <= e -- no max-subtraction needed for numerical stability.
    e = jnp.exp(a)

    # One combined validity mask; built only for axes that actually have
    # padding (nl, nr, nlp, nrp are static Python ints -> trace-time skip).
    mask = None
    if nl < nlp:
        mask = jax.lax.broadcasted_iota(jnp.int32, (nlp, nrp), 0) < nl
    if nr < nrp:
        col_ok = jax.lax.broadcasted_iota(jnp.int32, (nlp, nrp), 1) < nr
        mask = col_ok if mask is None else (mask & col_ok)
    if mask is not None:
        e = jnp.where(mask, e, 0.0)

    # Single bf16 cast of the (big) masked exponentials; reused by all dots.
    e_b = e.astype(jnp.bfloat16)

    tiny = jnp.float32(1e-30)

    # softmax(a, dim=1) denominators: row sums, (NLP, 1), exact f32.
    # Fold them into the small hl operand instead of materializing p1.
    row_sum = jnp.sum(e, axis=1, keepdims=True)
    hl_scaled_b = (hl * (1.0 / jnp.maximum(row_sum, tiny))).astype(jnp.bfloat16)

    # softmax(a, dim=0) denominators: column sums, produced directly as a
    # column (NRP, 1) via a tiny extra MXU dot (avoids any (1,N)->(N,1)
    # relayout).  Using e_b keeps numerator and denominator consistent.
    ones_b = jnp.ones((nlp, 128), jnp.bfloat16)
    col_sum = jax.lax.dot_general(
        e_b, ones_b, (((0,), (0,)), ((), ())),
        preferred_element_type=jnp.float32)[:, 0:1]               # (NRP, 1)
    hr_scaled_b = (hr * (1.0 / jnp.maximum(col_sum, tiny))).astype(jnp.bfloat16)

    # mu_lr = hr - softmax(a,1)^T @ hl = hr - e^T @ (hl / row_sum)
    # (contract axis 0 of e with axis 0 of hl_scaled; padded hl rows are zero).
    mu_lr_ref[...] = hr - jax.lax.dot_general(
        e_b, hl_scaled_b, (((0,), (0,)), ((), ())),
        preferred_element_type=jnp.float32)

    # mu_rl = hl - softmax(a,0) @ hr = hl - e @ (hr / col_sum)
    mu_rl_ref[...] = hl - jax.lax.dot_general(
        e_b, hr_scaled_b, (((1,), (0,)), ((), ())),
        preferred_element_type=jnp.float32)


def _round_up(x, m):
    return ((x + m - 1) // m) * m


def _vmem_limit_bytes(nlp, nrp, dp):
    # Resident footprint: inputs + outputs (f32) + big (NLP,NRP) temporaries
    # (a / e in f32, e_b in bf16) + small scaled operands, with 2x headroom.
    io = 2 * (nlp + nrp) * dp * 4 * 2
    big = nlp * nrp * (4 + 4 + 2)
    small = (nlp + nrp) * dp * (4 + 2) + nlp * 128 * 2
    need = 2 * (io + big + small) + (1 << 20)
    return int(min(max(need, 16 << 20), 64 << 20))


@jax.jit
def attention(hl, hr):
    """Pallas TPU implementation of Attention.forward. hl:(Nl,D), hr:(Nr,D)."""
    nl, d = hl.shape
    nr, d2 = hr.shape
    assert d == d2, (d, d2)

    dp = _round_up(d, 128)        # lane-dense feature dim
    nlp = _round_up(nl, 16)       # 16-row aligned (bf16 packs 2 rows/sublane)
    nrp = _round_up(nr, 16)

    # NOTE: if this op is called repeatedly, hoist these pads (and the final
    # slices) out of the hot path or batch pairs so they amortize.
    hl_p = jnp.zeros((nlp, dp), jnp.float32).at[:nl, :d].set(
        hl.astype(jnp.float32))
    hr_p = jnp.zeros((nrp, dp), jnp.float32).at[:nr, :d].set(
        hr.astype(jnp.float32))

    vmem = pl.BlockSpec(memory_space=pltpu.MemorySpace.VMEM)
    mu_lr_p, mu_rl_p = pl.pallas_call(
        functools.partial(_attention_kernel, nl=nl, nr=nr),
        out_shape=(jax.ShapeDtypeStruct((nrp, dp), jnp.float32),
                   jax.ShapeDtypeStruct((nlp, dp), jnp.float32)),
        in_specs=[vmem, vmem],
        out_specs=(vmem, vmem),
        compiler_params=pltpu.CompilerParams(
            vmem_limit_bytes=_vmem_limit_bytes(nlp, nrp, dp)),
    )(hl_p, hr_p)

    # Strip the padding.
    return mu_lr_p[:nr, :d], mu_rl_p[:nl, :d]


def attention_reference(hl, hr):
    """Pure-jnp mirror of the PyTorch forward (f32 end-to-end)."""
    hl = hl / jnp.linalg.norm(hl, axis=-1, keepdims=True)
    hr = hr / jnp.linalg.norm(hr, axis=-1, keepdims=True)
    a = hl @ hr.T
    mu_lr = hr - jax.nn.softmax(a, axis=1).T @ hl
    mu_rl = hl - jax.nn.softmax(a, axis=0) @ hr
    return mu_lr, mu_rl


if __name__ == "__main__":
    key = jax.random.PRNGKey(0)
    k_l, k_r = jax.random.split(key)

    # Small shapes consistent with the module: two node-feature matrices.
    Nl, Nr, D = 16, 12, 8
    hl = jax.random.normal(k_l, (Nl, D), jnp.float32)
    hr = jax.random.normal(k_r, (Nr, D), jnp.float32)

    mu_lr, mu_rl = jax.block_until_ready(attention(hl, hr))
    ref_lr, ref_rl = attention_reference(hl, hr)

    assert mu_lr.shape == (Nr, D), mu_lr.shape
    assert mu_rl.shape == (Nl, D), mu_rl.shape
    # Tolerance accounts for bf16 MXU operands (e, scaled hl/hr) w/ f32 accum.
    assert jnp.allclose(mu_lr, ref_lr, atol=5e-3, rtol=5e-3), (mu_lr, ref_lr)
    assert jnp.allclose(mu_rl, ref_rl, atol=5e-3, rtol=5e-3), (mu_rl, ref_rl)
    print("KERNEL_OK")
</pallas_src>

<mosaic_0001>
module attributes {stable_mosaic.version = 11 : i64} {
  func.func @_attention_kernel(%arg0: memref<16x128xf32, #tpu.memory_space<vmem>>, %arg1: memref<16x128xf32, #tpu.memory_space<vmem>>, %arg2: memref<16x128xf32, #tpu.memory_space<vmem>>, %arg3: memref<16x128xf32, #tpu.memory_space<vmem>>) attributes {dimension_semantics = [], scalar_prefetch = 0 : i64, scratch_operands = 0 : i64, tpu.core_type = #tpu.core_type<tc>} {
    %c0 = arith.constant 0 : index
    %c0_0 = arith.constant 0 : index
    %0 = vector.load %arg0[%c0, %c0_0] : memref<16x128xf32, #tpu.memory_space<vmem>>, vector<16x128xf32>
    %c0_1 = arith.constant 0 : index
    %c0_2 = arith.constant 0 : index
    %1 = vector.load %arg1[%c0_1, %c0_2] : memref<16x128xf32, #tpu.memory_space<vmem>>, vector<16x128xf32>
    %2 = arith.mulf %0, %0 : vector<16x128xf32>
    %cst = arith.constant dense<0.000000e+00> : vector<16xf32>
    %3 = vector.multi_reduction <add>, %2, %cst [1] : vector<16x128xf32> to vector<16xf32>
    %4 = vector.shape_cast %3 : vector<16xf32> to vector<16x1xf32>
    %cst_3 = arith.constant 9.99999996E-13 : f32
    %5 = vector.broadcast %cst_3 : f32 to vector<16x1xf32>
    %6 = arith.addf %4, %5 : vector<16x1xf32>
    %7 = math.rsqrt %6 : vector<16x1xf32>
    %8 = vector.broadcast %7 : vector<16x1xf32> to vector<16x128xf32>
    %9 = arith.mulf %0, %8 : vector<16x128xf32>
    %10 = arith.mulf %1, %1 : vector<16x128xf32>
    %cst_4 = arith.constant dense<0.000000e+00> : vector<16xf32>
    %11 = vector.multi_reduction <add>, %10, %cst_4 [1] : vector<16x128xf32> to vector<16xf32>
    %12 = vector.shape_cast %11 : vector<16xf32> to vector<16x1xf32>
    %cst_5 = arith.constant 9.99999996E-13 : f32
    %13 = vector.broadcast %cst_5 : f32 to vector<16x1xf32>
    %14 = arith.addf %12, %13 : vector<16x1xf32>
    %15 = math.rsqrt %14 : vector<16x1xf32>
    %16 = vector.broadcast %15 : vector<16x1xf32> to vector<16x128xf32>
    %17 = arith.mulf %1, %16 : vector<16x128xf32>
    %18 = arith.truncf %9 : vector<16x128xf32> to vector<16x128xbf16>
    %19 = arith.truncf %17 : vector<16x128xf32> to vector<16x128xbf16>
    %cst_6 = arith.constant dense<0.000000e+00> : vector<16x16xf32>
    %20 = tpu.matmul %18, %19, %cst_6 {dimension_numbers = #tpu.dot_dimension_numbers<[1], [1], [0], [0], [0, 0, 1, 0], [], []>} : vector<16x128xbf16>, vector<16x128xbf16>, vector<16x16xf32> -> vector<16x16xf32>
    %21 = math.exp %20 : vector<16x16xf32>
    %22 = tpu.iota {dimensions = array<i32: 1>} : vector<16x16xi32>
    %c12_i32 = arith.constant 12 : i32
    %23 = vector.broadcast %c12_i32 : i32 to vector<16x16xi32>
    %24 = arith.cmpi slt, %22, %23 : vector<16x16xi32>
    %cst_7 = arith.constant 0.000000e+00 : f32
    %25 = vector.broadcast %cst_7 : f32 to vector<16x16xf32>
    %26 = arith.select %24, %21, %25 : vector<16x16xi1>, vector<16x16xf32>
    %27 = arith.truncf %26 : vector<16x16xf32> to vector<16x16xbf16>
    %cst_8 = arith.constant dense<0.000000e+00> : vector<16xf32>
    %28 = vector.multi_reduction <add>, %26, %cst_8 [1] : vector<16x16xf32> to vector<16xf32>
    %29 = vector.shape_cast %28 : vector<16xf32> to vector<16x1xf32>
    %cst_9 = arith.constant 1.000000e-30 : f32
    %30 = vector.broadcast %cst_9 : f32 to vector<16x1xf32>
    %31 = arith.maximumf %29, %30 : vector<16x1xf32>
    %cst_10 = arith.constant 1.000000e+00 : f32
    %32 = vector.broadcast %cst_10 : f32 to vector<16x1xf32>
    %33 = arith.divf %32, %31 : vector<16x1xf32>
    %34 = vector.broadcast %33 : vector<16x1xf32> to vector<16x128xf32>
    %35 = arith.mulf %9, %34 : vector<16x128xf32>
    %36 = arith.truncf %35 : vector<16x128xf32> to vector<16x128xbf16>
    %cst_11 = arith.constant 1.000000e+00 : bf16
    %37 = vector.broadcast %cst_11 : bf16 to vector<16x128xbf16>
    %cst_12 = arith.constant dense<0.000000e+00> : vector<16x128xf32>
    %38 = tpu.matmul %27, %37, %cst_12 {dimension_numbers = #tpu.dot_dimension_numbers<[0], [0], [1], [1], [0, 1, 1, 1], [], []>} : vector<16x16xbf16>, vector<16x128xbf16>, vector<16x128xf32> -> vector<16x128xf32>
    %39 = vector.extract_strided_slice %38 {offsets = [0, 0], sizes = [16, 1], strides = [1, 1]} : vector<16x128xf32> to vector<16x1xf32>
    %cst_13 = arith.constant 1.000000e-30 : f32
    %40 = vector.broadcast %cst_13 : f32 to vector<16x1xf32>
    %41 = arith.maximumf %39, %40 : vector<16x1xf32>
    %cst_14 = arith.constant 1.000000e+00 : f32
    %42 = vector.broadcast %cst_14 : f32 to vector<16x1xf32>
    %43 = arith.divf %42, %41 : vector<16x1xf32>
    %44 = vector.broadcast %43 : vector<16x1xf32> to vector<16x128xf32>
    %45 = arith.mulf %17, %44 : vector<16x128xf32>
    %46 = arith.truncf %45 : vector<16x128xf32> to vector<16x128xbf16>
    %cst_15 = arith.constant dense<0.000000e+00> : vector<16x128xf32>
    %47 = tpu.matmul %27, %36, %cst_15 {dimension_numbers = #tpu.dot_dimension_numbers<[0], [0], [1], [1], [0, 1, 1, 1], [], []>} : vector<16x16xbf16>, vector<16x128xbf16>, vector<16x128xf32> -> vector<16x128xf32>
    %48 = arith.subf %17, %47 : vector<16x128xf32>
    %c0_16 = arith.constant 0 : index
    %c0_17 = arith.constant 0 : index
    %49 = vector.load %arg2[%c0_16, %c0_17] : memref<16x128xf32, #tpu.memory_space<vmem>>, vector<16x128xf32>
    tpu.vector_store %arg2[%c0_16, %c0_17], %48 {strides = array<i32>} : memref<16x128xf32, #tpu.memory_space<vmem>>, vector<16x128xf32>,
    %cst_18 = arith.constant dense<0.000000e+00> : vector<16x128xf32>
    %50 = tpu.matmul %27, %46, %cst_18 {dimension_numbers = #tpu.dot_dimension_numbers<[1], [0], [0], [1], [0, 0, 1, 1], [], []>} : vector<16x16xbf16>, vector<16x128xbf16>, vector<16x128xf32> -> vector<16x128xf32>
    %51 = arith.subf %9, %50 : vector<16x128xf32>
    %c0_19 = arith.constant 0 : index
    %c0_20 = arith.constant 0 : index
    %52 = vector.load %arg3[%c0_19, %c0_20] : memref<16x128xf32, #tpu.memory_space<vmem>>, vector<16x128xf32>
    tpu.vector_store %arg3[%c0_19, %c0_20], %51 {strides = array<i32>} : memref<16x128xf32, #tpu.memory_space<vmem>>, vector<16x128xf32>,
    return
  }
}

</mosaic_0001>

<bundles_post_ra>
// kernel: attention.1
= control target key start
LH: loop header
LB: loop body
LE: loop exit
PB: predicated region body
PF: predicated region fallthrough
CT: control target
= control target key end

     0   :  { %v353_v8 = vmov 0.0   ;;  %vm354_vm0 = vmmov 0   ;;  %v355_v27 = vmov 1065369472   ;;  %v90_v34 = vlaneseq  ;;  %s430_s1 = inlined_call_operand.vmem [shape: f32[16,128], index: 1, kind: input, shape index: {}]   ;;  %s431_s0 = inlined_call_operand.vmem [shape: f32[16,128], index: 0, kind: input, shape index: {}]   ;;  %s432_s2 = inlined_call_operand.vmem [shape: f32[16,128], index: 2, kind: output, shape index: {0}]   ;;  %s433_s3 = inlined_call_operand.vmem [shape: f32[16,128], index: 3, kind: output, shape index: {1}]  }
   0x1   :  { %v17_v0 = vld [vmem:[%s430_s1] sm:$0xff]  ;;  %v18_v2 = vld [vmem:[%s430_s1 + $0x8] sm:$0xff]  ;;  %303 = vmatprep.subr.bf16.mxu0 %v353_v8  ;;  %309 = vmatprep.subr.bf16.mxu1 %v353_v8  ;;  %vm96_vm2 = vcmask 130048   ;;  %v356_v53 = vmov 0  }
   0x2   :  { %v15_v1 = vld [vmem:[%s431_s0] sm:$0xff]  ;;  %v31_v3 = vmul.f32 %v17_v0, %v17_v0  ;;  %v16_v5 = vld [vmem:[%s431_s0 + $0x8] sm:$0xff]  ;;  %v32_v6 = vmul.f32 %v18_v2, %v18_v2  ;;  %305 = vmatprep.mubr.msk.bf16.mxu0 %vm354_vm0, %v353_v8  ;;  %311 = vmatprep.mubr.msk.bf16.mxu1 %vm354_vm0, %v353_v8  ;;  %v91_v35 = vand.u32 127, %v90_v34 }
   0x3   :  { %v19_v4 = vmul.f32 %v15_v1, %v15_v1  ;;  %v20_v7 = vmul.f32 %v16_v5, %v16_v5  ;;  %310 = vmatpush3.bf16.msra.mxu1 %v355_v27  ;;  %331 = vset.pattern.permute.xlu1 %v356_v53 }
   0x4   :  { %33 = vadd.xlane.f32.xlu0 %v31_v3  ;;  %315 = vmatprep.subr.bf16.mxu1 %v353_v8  ;;  %vm92_vm1 = vcmp.lt.s32.totalorder %v91_v35, 12 }
   0x5   :  { %21 = vadd.xlane.f32.xlu1 %v19_v4 }
   0x8   :  { %35 = vadd.xlane.f32.xlu0 %v32_v6 }
   0x9   :  { %23 = vadd.xlane.f32.xlu1 %v20_v7 }
  0x8d   :  { %v34_v9 = vpop.xlane.xlu0 %33 }
  0x8e   :  { %v22_v10 = vpop.xlane.xlu1 %21  ;;  %v37_v11 = vadd.f32 1e-12, %v34_v9 }
  0x8f   :  { %v25_v14 = vadd.f32 1e-12, %v22_v10 }
  0x90   :  { %333 = vrsqrt.f32 %v37_v11 }
  0x91   :  { %v36_v12 = vpop.xlane.xlu0 %35 }
  0x92   :  { %v24_v13 = vpop.xlane.xlu1 %23  ;;  %v38_v15 = vadd.f32 1e-12, %v36_v12 }
  0x93   :  { %v26_v16 = vadd.f32 1e-12, %v24_v13 }
  0x94   :  { %335 = vrsqrt.f32 %v38_v15 }
  0x95   :  { %337 = vrsqrt.f32 %v25_v14 }
  0x96   :  { %339 = vrsqrt.f32 %v26_v16 }
  0x9d   :  { %v334_v17 = vpop.eup %333 }
  0x9e   :  { %v391_v19 = vmul.f32 %v334_v17, %v17_v0 }
  0xa1   :  { %v336_v18 = vpop.eup %335 }
  0xa2   :  { %v393_v20 = vmul.f32 %v336_v18, %v18_v2  ;;  %v338_v21 = vpop.eup %337 }
  0xa3   :  { %v340_v22 = vpop.eup %339  ;;  %v397_v24 = vmul.f32 %v338_v21, %v15_v1 }
  0xa4   :  { %v44_v23 = vpack.c.bf16 %v393_v20, %v391_v19  ;;  %v399_v25 = vmul.f32 %v340_v22, %v16_v5 }
  0xa6   :  { %304 = vmatpush3.bf16.xpose.msra.mxu0 %v44_v23  ;;  %v43_v26 = vpack.c.bf16 %v399_v25, %v397_v24 }
  0xa7   :  { %321 = vmatprep.subr.bf16.mxu0 %v353_v8 }
  0xad   :  { %306 = vmatmul.mubr.bf16.vlgmr.msra.gmra.mxu0 %v43_v26 }
  0xae   :  { %323 = vmatprep.mubr.msk.bf16.mxu0 %vm354_vm0, %v353_v8 }
 0x16d   :  { %v79_v28 = vpop.f32.mrf.mxu0 }
 0x16e   :  { %v86_v29 = vmul.f32 1.442695, %v79_v28 }
 0x16f   :  { %v307_v30 = vpop.f32.mrf.mxu0 }
 0x170   :  { %341 = vpow2.f32 %v86_v29 }
 0x171   :  { %v82_v31 = vpop.f32.mrf.mxu0 }
 0x172   :  { %v88_v32 = vmul.f32 1.442695, %v82_v31 }
 0x173   :  { %v308_v33 = vpop.f32.mrf.mxu0 }
 0x174   :  { %343 = vpow2.f32 %v88_v32 }
 0x17d   :  { %v342_v36 = vpop.eup %341 }
 0x17e   :  { %v93_v37 = vsel %vm92_vm1, %v342_v36, 0.0 }
 0x17f   :  { %v97_v38 = vsel %vm96_vm2, %v93_v37, 0.0 }
 0x180   :  { %98 = vadd.xlane.f32.xlu1 %v97_v38 }
 0x181   :  { %v344_v39 = vpop.eup %343 }
 0x182   :  { %v94_v40 = vsel %vm92_vm1, %v344_v39, 0.0 }
 0x183   :  { %v100_v41 = vsel %vm96_vm2, %v94_v40, 0.0  ;;  %v95_v42 = vpack.c.bf16 %v94_v40, %v93_v37 }
 0x184   :  { %101 = vadd.xlane.f32.xlu1 %v100_v41 }
 0x185   :  { %112 = vxpose.xlu0.c.b16.start.end [1/1] (short) (narrow) %v95_v42, 16 }
 0x18e   :  { %332 = vset.pattern.permute.xlu0 %v356_v53 }
 0x1e7   :  { %v120_v43 = vpop.trf.xlu0 }
 0x1e8   :  { %312 = vmatmul.mubr.msk.bf16.vlgmr.msra.gmra.mxu1 %vm96_vm2, %v120_v43 }
 0x1e9   :  { %317 = vmatprep.mubr.msk.bf16.mxu1 %vm354_vm0, %v353_v8 }
 0x209   :  { %v99_v44 = vpop.xlane.xlu1 %98 }
 0x20a   :  { %v103_v45 = vmax.f32 %v99_v44, 1e-30 }
 0x20c   :  { %345 = vrcp.f32 %v103_v45 }
 0x20d   :  { %v102_v46 = vpop.xlane.xlu1 %101 }
 0x20e   :  { %v104_v47 = vmax.f32 %v102_v46, 1e-30 }
 0x210   :  { %347 = vrcp.f32 %v104_v47 }
 0x219   :  { %v346_v48 = vpop.eup %345 }
 0x21a   :  { %v109_v50 = vmul.f32 %v346_v48, %v397_v24 }
 0x21d   :  { %v348_v49 = vpop.eup %347 }
 0x21e   :  { %v110_v51 = vmul.f32 %v348_v49, %v399_v25 }
 0x220   :  { %v111_v52 = vpack.c.bf16 %v110_v51, %v109_v50 }
 0x222   :  { %316 = vmatpush3.bf16.msra.mxu1 %v111_v52 }
 0x225   :  { %318 = vmatmul.mubr.msk.bf16.vlgmr.msra.gmra.mxu1 %vm96_vm2, %v120_v43 }
 0x2a8   :  { %v165_v54 = vpop.f32.mrf.mxu1 }
 0x2a9   :  { %v172_v55 = vmax.f32 %v165_v54, 1e-30 }
 0x2aa   :  { %v313_v56 = vpop.f32.mrf.mxu1 }
 0x2ab   :  { %349 = vrcp.f32 %v172_v55 }
 0x2ac   :  { %v168_v57 = vpop.f32.mrf.mxu1 }
 0x2ad   :  { %v173_v58 = vmax.f32 %v168_v57, 1e-30 }
 0x2ae   :  { %v314_v59 = vpop.f32.mrf.mxu1 }
 0x2af   :  { %351 = vrcp.f32 %v173_v58 }
 0x2b8   :  { %v350_v60 = vpop.eup %349 }
 0x2b9   :  { %180 = vperm.xlu1 %331, %v350_v60  }
 0x2bc   :  { %v352_v61 = vpop.eup %351 }
 0x2bd   :  { %185 = vperm.xlu1 %331, %v352_v61  }
 0x2e5   :  { %v225_v62 = vpop.f32.mrf.mxu1 }
 0x2e6   :  { %v232_v63 = vsub.f32 %v391_v19, %v225_v62 }
 0x2e7   :  { %v319_v0 = vpop.f32.mrf.mxu1 }
 0x2e8   :  { %234 = vst [vmem:[%s432_s2] sm:$0xff] %v232_v63 }
 0x2e9   :  { %v228_v1 = vpop.f32.mrf.mxu1 }
 0x2ea   :  { %v233_v2 = vsub.f32 %v393_v20, %v228_v1 }
 0x2eb   :  { %v320_v3 = vpop.f32.mrf.mxu1 }
 0x2ec   :  { %235 = vst [vmem:[%s432_s2 + $0x8] sm:$0xff] %v233_v2 }
 0x334   :  { %v181_v4 = vpop.permute.xlu1 %180 }
 0x335   :  { %v188_v6 = vmul.f32 %v181_v4, %v391_v19 }
 0x338   :  { %v186_v5 = vpop.permute.xlu1 %185 }
 0x339   :  { %v189_v7 = vmul.f32 %v186_v5, %v393_v20 }
 0x33b   :  { %v190_v8 = vpack.c.bf16 %v189_v7, %v188_v6 }
 0x33d   :  { %322 = vmatpush3.bf16.msra.mxu0 %v190_v8 }
 0x340   :  { %324 = vmatmul.mubr.msk.bf16.vlgmr.msra.gmra.mxu0 %vm96_vm2, %v95_v42 }
 0x400   :  { %v273_v9 = vpop.f32.mrf.mxu0 }
 0x401   :  { %v280_v10 = vsub.f32 %v397_v24, %v273_v9 }
 0x402   :  { %v325_v11 = vpop.f32.mrf.mxu0 }
 0x403   :  { %282 = vst [vmem:[%s433_s3] sm:$0xff] %v280_v10 }
 0x404   :  { %v276_v12 = vpop.f32.mrf.mxu0 }
 0x405   :  { %v281_v13 = vsub.f32 %v399_v25, %v276_v12 }
 0x406   :  { %v326_v14 = vpop.f32.mrf.mxu0 }
 0x407   :  { %283 = vst [vmem:[%s433_s3 + $0x8] sm:$0xff] %v281_v13 }

</bundles_post_ra>
